<compile_context>
chip_gen: v7x
topology: tpu7x:2x2x1
jax: 0.10.0
libtpu: 0.0.40
codegen_flags: <defaults>
</compile_context>

<pallas_src>
import functools

import jax
import jax.numpy as jnp
from jax.experimental import pallas as pl
from jax.experimental.pallas import tpu as pltpu


def _rmsnorm_kernel(x_ref, w_ref, y_ref, *, eps: float, inv_d: float):
    # x_ref: (TR, D) tile of rows; w_ref: (1, D) f32; y_ref: (TR, D)
    x = x_ref[...].astype(jnp.float32)
    w = w_ref[...]                                   # already f32, broadcasts over rows
    var = jnp.sum(x * x, axis=-1, keepdims=True) * inv_d
    rstd = jax.lax.rsqrt(var + eps)                  # EUP transcendental
    y_ref[...] = ((x * rstd) * w).astype(y_ref.dtype)


def _pick_row_tile(T: int, D: int) -> int:
    """Largest row tile (multiple of 8, <=1024) targeting ~4 MiB of f32 per block."""
    target_bytes = 4 << 20                           # ~4 MiB f32 working set per block
    tr = target_bytes // max(D * 4, 1)
    tr = max(8, min(1024, (tr // 8) * 8))
    t_pad8 = ((T + 7) // 8) * 8                      # don't exceed (8-padded) T
    return min(tr, t_pad8)


def rms_norm_pallas(x: jax.Array, weight: jax.Array, eps: float = 1e-5) -> jax.Array:
    """RMSNorm over the last axis of x. weight shape: (hidden,)."""
    orig_shape = x.shape
    D = orig_shape[-1]
    x2d = x.reshape(-1, D)
    T = x2d.shape[0]

    TR = _pick_row_tile(T, D)
    T_pad = pl.cdiv(T, TR) * TR
    if T_pad != T:
        # Pad rows with zeros: var=0, rstd=rsqrt(eps) finite, y=0 -> no NaNs,
        # padded rows are sliced off below.
        x2d = jnp.pad(x2d, ((0, T_pad - T), (0, 0)))

    grid = (T_pad // TR,)

    # Cast weight to f32 once in the wrapper; kernel consumes it directly.
    w2d = weight.astype(jnp.float32).reshape(1, D)

    kernel = functools.partial(_rmsnorm_kernel, eps=float(eps), inv_d=1.0 / float(D))

    y2d = pl.pallas_call(
        kernel,
        out_shape=jax.ShapeDtypeStruct((T_pad, D), x.dtype),
        grid_spec=pltpu.PrefetchScalarGridSpec(
            num_scalar_prefetch=0,
            grid=grid,
            in_specs=[
                pl.BlockSpec((TR, D), lambda i: (i, 0)),
                pl.BlockSpec((1, D), lambda i: (0, 0)),   # weight stays resident
            ],
            out_specs=pl.BlockSpec((TR, D), lambda i: (i, 0)),
        ),
        compiler_params=pltpu.CompilerParams(
            dimension_semantics=("parallel",),
            vmem_limit_bytes=48 << 20,  # large tiles + double-buffering; fits v7x too
        ),
    )(x2d, w2d)

    if T_pad != T:
        y2d = y2d[:T]
    return y2d.reshape(orig_shape)


class RMSNormPallas:
    """Mirror of fla RMSNorm (elementwise_affine=True, bias=False)."""

    def __init__(self, hidden_size: int, eps: float = 1e-5):
        self.hidden_size = hidden_size
        self.eps = eps
        # reset_parameters(): weight <- ones; bias is None by default.
        self.weight = jnp.ones((hidden_size,), dtype=jnp.float32)
        # TODO(synk): residual / prenorm / residual_in_fp32 paths and the
        # backward (layer_norm_bwd) are not implemented (forward-only kernel).

    def __call__(self, x: jax.Array) -> jax.Array:
        return rms_norm_pallas(x, self.weight, eps=self.eps)


if __name__ == "__main__":
    key = jax.random.PRNGKey(0)
    batch, seq, hidden = 2, 8, 32
    x = jax.random.normal(key, (batch, seq, hidden), dtype=jnp.float32)

    norm = RMSNormPallas(hidden, eps=1e-5)
    y = norm(x)
    y = jax.block_until_ready(y)

    # Reference check (pure JAX).
    xf = x.astype(jnp.float32)
    var = jnp.mean(xf * xf, axis=-1, keepdims=True)
    y_ref = (xf * jax.lax.rsqrt(var + 1e-5)) * norm.weight
    assert y.shape == x.shape and y.dtype == x.dtype
    assert jnp.allclose(y, y_ref.astype(x.dtype), atol=1e-5, rtol=1e-5)

    # Also exercise a ragged-T path (T not a multiple of the row tile / 8).
    x2 = jax.random.normal(jax.random.PRNGKey(1), (3, 5, hidden), dtype=jnp.float32)
    y2 = jax.block_until_ready(norm(x2))
    xf2 = x2.astype(jnp.float32)
    var2 = jnp.mean(xf2 * xf2, axis=-1, keepdims=True)
    y2_ref = (xf2 * jax.lax.rsqrt(var2 + 1e-5)) * norm.weight
    assert jnp.allclose(y2, y2_ref.astype(x2.dtype), atol=1e-5, rtol=1e-5)

    print("KERNEL_OK")
</pallas_src>

<mosaic_0001>
module attributes {stable_mosaic.version = 11 : i64} {
  func.func @_rmsnorm_kernel(%arg0: i32, %arg1: memref<16x32xf32, #tpu.memory_space<vmem>>, %arg2: memref<1x32xf32, #tpu.memory_space<vmem>>, %arg3: memref<16x32xf32, #tpu.memory_space<vmem>>) attributes {dimension_semantics = [#tpu.dimension_semantics<parallel>], iteration_bounds = array<i64: 1>, scalar_prefetch = 0 : i64, scratch_operands = 0 : i64, tpu.core_type = #tpu.core_type<tc>, window_params = [{transform_indices = @transform_0, window_bounds = array<i64: 16, 32>}, {pipeline_mode = #tpu.pipeline_mode<synchronous>, transform_indices = @transform_1, window_bounds = array<i64: 1, 32>}, {transform_indices = @transform_2, window_bounds = array<i64: 16, 32>}]} {
    %c0 = arith.constant 0 : index
    %c0_0 = arith.constant 0 : index
    %0 = vector.load %arg1[%c0, %c0_0] : memref<16x32xf32, #tpu.memory_space<vmem>>, vector<16x32xf32>
    %c0_1 = arith.constant 0 : index
    %c0_2 = arith.constant 0 : index
    %1 = vector.load %arg2[%c0_1, %c0_2] : memref<1x32xf32, #tpu.memory_space<vmem>>, vector<1x32xf32>
    %2 = arith.mulf %0, %0 : vector<16x32xf32>
    %cst = arith.constant dense<0.000000e+00> : vector<16xf32>
    %3 = vector.multi_reduction <add>, %2, %cst [1] : vector<16x32xf32> to vector<16xf32>
    %4 = vector.shape_cast %3 : vector<16xf32> to vector<16x1xf32>
    %cst_3 = arith.constant 3.125000e-02 : f32
    %5 = vector.broadcast %cst_3 : f32 to vector<16x1xf32>
    %6 = arith.mulf %4, %5 : vector<16x1xf32>
    %cst_4 = arith.constant 9.99999974E-6 : f32
    %7 = vector.broadcast %cst_4 : f32 to vector<16x1xf32>
    %8 = arith.addf %6, %7 : vector<16x1xf32>
    %9 = math.rsqrt %8 : vector<16x1xf32>
    %10 = vector.broadcast %9 : vector<16x1xf32> to vector<16x32xf32>
    %11 = arith.mulf %0, %10 : vector<16x32xf32>
    %12 = vector.broadcast %1 : vector<1x32xf32> to vector<16x32xf32>
    %13 = arith.mulf %11, %12 : vector<16x32xf32>
    %c0_5 = arith.constant 0 : index
    %c0_6 = arith.constant 0 : index
    %14 = vector.load %arg3[%c0_5, %c0_6] : memref<16x32xf32, #tpu.memory_space<vmem>>, vector<16x32xf32>
    tpu.vector_store %arg3[%c0_5, %c0_6], %13 {strides = array<i32>} : memref<16x32xf32, #tpu.memory_space<vmem>>, vector<16x32xf32>,
    return
  }
  func.func @transform_0(%arg0: i32) -> (i32, i32) {
    %c0_i32 = arith.constant 0 : i32
    %c0_i32_0 = arith.constant 0 : i32
    return %arg0, %c0_i32 : i32, i32
  }
  func.func @transform_1(%arg0: i32) -> (i32, i32) {
    %c0_i32 = arith.constant 0 : i32
    %c0_i32_0 = arith.constant 0 : i32
    %c0_i32_1 = arith.constant 0 : i32
    return %c0_i32, %c0_i32_0 : i32, i32
  }
  func.func @transform_2(%arg0: i32) -> (i32, i32) {
    %c0_i32 = arith.constant 0 : i32
    %c0_i32_0 = arith.constant 0 : i32
    return %arg0, %c0_i32 : i32, i32
  }
}

</mosaic_0001>

<bundles_post_ra>
// kernel: tpu_custom_call.1
= control target key start
LH: loop header
LB: loop body
LE: loop exit
PB: predicated region body
PF: predicated region fallthrough
CT: control target
= control target key end

     0   :  { %7 = vsyncpa [#allocation3], 0  ;;  %s186_s0 = inlined_call_operand.hbm [shape: f32[16,32], index: 0, kind: input, shape index: {}]   ;;  %s187_s1 = inlined_call_operand.vmem [shape: f32[1,32], index: 1, kind: input, shape index: {}]   ;;  %s188_s2 = inlined_call_operand.hbm [shape: f32[16,32], index: 2, kind: output, shape index: {}]  }
   0x1   :  { %8 = vsyncpa [#allocation4], 0  ;;  %s130_s9 = smov [#allocation2]   ;;  %s82_s13 = scalar_lea.hbm %s186_s0, 256 }
   0x2   :  { %s14_s10 = sshll.u32 %s130_s9, 4  ;;  %p83_p0 = scmp.ne.s32.totalorder %s186_s0, %s82_s13  ;;  %s15_s10 = int_to_ptr.vmem [resolvable:$true] %s14_s10 }
   0x3   :  { %p86_p1 = scmp.lt.u32.totalorder %s82_s13, %s186_s0 }
   0x5   :  { %p88_p2 = pnand %p86_p1, %p83_p0 }
   0x7   :  { %91 = shalt.err (!%p88_p2)
}
   0x8   :  { %s92_s18 = scalar_lea.vmem %s15_s10, 256  ;;  %p97_p4 = scmp.lt.s32.totalorder %s15_s10, %s15_s10 }
   0x9   :  { %p93_p3 = scmp.ne.s32.totalorder %s15_s10, %s92_s18  ;;  %p98_p5 = scmp.lt.s32.totalorder %s92_s18, %s92_s18 }
   0xb   :  { %p99_p6 = por %p98_p5, %p97_p4 }
   0xd   :  { %p100_p7 = pnand %p99_p6, %p93_p3 }
   0xf   :  { %103 = shalt.err (!%p100_p7)
}
  0x10   :  { %s131_s19 = smov 128   ;;  %s132_s20 = smov 8  }
  0x11   :  { %20 = dma.hbm_to_vmem [thread:$0]  %s186_s0, 256, %s15_s10, [#allocation3], %s131_s19, %s131_s19, %s132_s20  }
  0x12   :  { %126 = dma.done.wait [#allocation3], 256  }
  0x13   :  { %127 = vsyncadd [#allocation3], 4294967040  ;;  %v26_v0 = vld [vmem:[#allocation2] sm:$0xff]  ;;  %vm31_vm0 = vcmask 261120   ;;  %v27_v1 = vld [vmem:[#allocation2 + $0x8] sm:$0xff]  ;;  %s133_s24 = smov [#allocation5]  }
  0x14   :  { %v29_v2 = vmul.f32 %v26_v0, %v26_v0  ;;  %v30_v3 = vmul.f32 %v27_v1, %v27_v1  ;;  %v73_v13 = vld [vmem:[%s187_s1] ss:$0 sm:$0xff]  ;;  %s61_s25 = sshll.u32 %s133_s24, 4  ;;  %s62_s25 = int_to_ptr.vmem [resolvable:$true] %s61_s25 }
  0x15   :  { %s104_s26 = scalar_lea.vmem %s62_s25, 256  ;;  %p109_p9 = scmp.lt.s32.totalorder %s62_s25, %s62_s25 }
  0x16   :  { %v32_v4 = vsel %vm31_vm0, %v29_v2, 0.0  ;;  %v35_v5 = vsel %vm31_vm0, %v30_v3, 0.0  ;;  %p105_p8 = scmp.ne.s32.totalorder %s62_s25, %s104_s26  ;;  %p110_p10 = scmp.lt.s32.totalorder %s104_s26, %s104_s26 }
  0x17   :  { %33 = vadd.xlane.f32.xlu0 %v32_v4 }
  0x18   :  { %p111_p11 = por %p110_p10, %p109_p9 }
  0x1a   :  { %p112_p12 = pnand %p111_p11, %p105_p8 }
  0x1b   :  { %36 = vadd.xlane.f32.xlu0 %v35_v5 }
  0xa4   :  { %v34_v6 = vpop.xlane.xlu0 %33 }
  0xa5   :  { %v38_v7 = vmul.f32 0.03125, %v34_v6 }
  0xa7   :  { %v40_v8 = vadd.f32 1e-05, %v38_v7 }
  0xa8   :  { %v37_v9 = vpop.xlane.xlu0 %36 }
  0xa9   :  { %78 = vrsqrt.f32 %v40_v8  ;;  %v39_v10 = vmul.f32 0.03125, %v37_v9 }
  0xab   :  { %v41_v11 = vadd.f32 1e-05, %v39_v10 }
  0xad   :  { %80 = vrsqrt.f32 %v41_v11 }
  0xb3   :  { %v79_v12 = vpop.eup %78 }
  0xb4   :  { %v44_v14 = vmul.f32 %v79_v12, %v26_v0 }
  0xb6   :  { %v52_v15 = vmul.f32 %v73_v13, %v44_v14 }
  0xb7   :  { %v81_v16 = vpop.eup %80 }
  0xb8   :  { %v45_v17 = vmul.f32 %v81_v16, %v27_v1  ;;  %54 = vst.msk [vmem:[#allocation5] sm:$0xff] %vm31_vm0, %v52_v15 }
  0xba   :  { %v53_v18 = vmul.f32 %v73_v13, %v45_v17 }
  0xbc   :  { %55 = vst.msk [vmem:[#allocation5 + $0x8] sm:$0xff] %vm31_vm0, %v53_v18 }
  0xbd   :  { %115 = shalt.err (!%p112_p12)
}
  0xbe   :  { %s116_s28 = scalar_lea.hbm %s188_s2, 256 }
  0xbf   :  { %p117_p13 = scmp.ne.s32.totalorder %s188_s2, %s116_s28  ;;  %p120_p0 = scmp.lt.u32.totalorder %s116_s28, %s188_s2 }
  0xc1   :  { %p122_p1 = pnand %p120_p0, %p117_p13 }
  0xc3   :  { %125 = shalt.err (!%p122_p1)
}
  0xc4   :  { %67 = dma.vmem_to_hbm [thread:$0]  %s62_s25, 256, %s188_s2, [#allocation4], %s131_s19, %s131_s19, %s132_s20  }
  0xc5   :  { %128 = dma.done.wait [#allocation4], 256  }
  0xc6   :  { %129 = vsyncadd [#allocation4], 4294967040 }
  0xc7   :  { %71 = vsyncpa [#allocation3], 1 }
  0xc8   :  { %72 = vsyncpa [#allocation4], 1 }

</bundles_post_ra>
